<compile_context>
chip_gen: v5e
topology: v5e:2x2
jax: 0.10.0
libtpu: 0.0.40
codegen_flags: <defaults>
</compile_context>

<pallas_src>
import functools
import math

import jax
import jax.numpy as jnp
from jax.experimental import pallas as pl
from jax.experimental.pallas import tpu as pltpu


def _round_up(x, m):
    return (x + m - 1) // m * m


def _actor_critic_kernel(
    x_ref,                 # (TILE_B, NI)              input dtype (f32), cast in-kernel
    w0_ref, b0_ref,        # fused first layer: (NI, 384) cdt, (1, 384) f32  [value 256 | policy 64 | 0s]
    pw1_ref, pb1_ref,      # policy hidden (lane-padded): (128, 128) cdt, (1, 128) f32
    muw_ref, mub_ref,      # policy head (lane-padded):   (128, PACK) cdt, (1, PACK) f32
    vw1_ref, vb1_ref,      # value hidden: (256, 256) cdt, (1, 256) f32
    vwrow_ref,             # value head as a row: (1, 256) f32
    onehot_ref,            # (1, PACK) f32, 1.0 at lane num_outputs
    vb_ref,                # value head bias scalar in SMEM: (1, 1)
    out_ref,               # packed output: (TILE_B, PACK) cdt; mu in [:no], v in lane no
    *,
    hidden_v,
):
    x = x_ref[...].astype(w0_ref.dtype)

    # Fused first layer feeding both towers: one MXU pass over N = 256 + 128,
    # one merged bias-add + relu VPU pass (f32).
    h_all = jnp.dot(x, w0_ref[...], preferred_element_type=jnp.float32) + b0_ref[...]
    h_all = jnp.maximum(h_all, 0.0)
    hv = h_all[:, :hidden_v]          # value tower activations  (lanes 0..255)
    hp = h_all[:, hidden_v:]          # policy tower activations (lanes 256..383, full 128-lane slab)

    # --- policy tower: relu(fc1) -> tanh(mu head), all slabs 128 lanes wide ---
    hp = jnp.maximum(
        jnp.dot(hp.astype(pw1_ref.dtype), pw1_ref[...],
                preferred_element_type=jnp.float32) + pb1_ref[...],
        0.0,
    )
    mu_full = jnp.tanh(
        jnp.dot(hp.astype(muw_ref.dtype), muw_ref[...],
                preferred_element_type=jnp.float32) + mub_ref[...]
    )  # (TILE_B, PACK); lanes >= num_outputs hold tanh(0) = 0 exactly

    # --- value tower: relu(fc1) -> N=1 head as a VPU*XLU lane reduction (f32) ---
    hv = jnp.maximum(
        jnp.dot(hv.astype(vw1_ref.dtype), vw1_ref[...],
                preferred_element_type=jnp.float32) + vb1_ref[...],
        0.0,
    )
    v = jnp.sum(hv * vwrow_ref[...], axis=-1, keepdims=True) + vb_ref[0, 0]

    # --- lane-dense packed store: out = mu + v * onehot (one FMA per vreg) ---
    out_ref[...] = (mu_full + v * onehot_ref[...]).astype(out_ref.dtype)


def make_params(key, num_inputs, num_outputs, hidden=(64, 64), hidden_v=(256, 256)):
    """Module-layout params, weights already transposed to (in, out), biases (1, out).

    Matches the module init: robot input/output layers are filled with 0.01,
    the shared hidden layers (p_fcs / v_fcs) use the default nn.Linear init.
    """
    k_p1, k_v1 = jax.random.split(key)

    def const_linear(fan_in, fan_out, val=0.01):
        return (jnp.full((fan_in, fan_out), val, jnp.float32),
                jnp.full((1, fan_out), val, jnp.float32))

    def uniform_linear(k, fan_in, fan_out):
        kw, kb = jax.random.split(k)
        bound = 1.0 / math.sqrt(fan_in)
        w = jax.random.uniform(kw, (fan_in, fan_out), jnp.float32, -bound, bound)
        b = jax.random.uniform(kb, (1, fan_out), jnp.float32, -bound, bound)
        return w, b

    p_w0, p_b0 = const_linear(num_inputs, hidden[0])         # robot_policy_input_modules[0]
    v_w0, v_b0 = const_linear(num_inputs, hidden_v[0])       # robot_value_input_modules[0]
    mu_w, mu_b = const_linear(hidden[-1], num_outputs)       # robot_policy_output_modules[0]
    v_w, v_b = const_linear(hidden_v[-1], 1)                 # robot_value_output_modules[0]
    p_w1, p_b1 = uniform_linear(k_p1, hidden[0], hidden[1])  # p_fcs[0]
    v_w1, v_b1 = uniform_linear(k_v1, hidden_v[0], hidden_v[1])  # v_fcs[0]
    return dict(
        p_w0=p_w0, p_b0=p_b0, p_w1=p_w1, p_b1=p_b1,
        mu_w=mu_w, mu_b=mu_b,
        v_w0=v_w0, v_b0=v_b0, v_w1=v_w1, v_b1=v_b1,
        v_w=v_w, v_b=v_b,
    )


def prepare_kernel_params(params, *, compute_dtype=jnp.bfloat16):
    """One-time prep: fuse/pad/transpose the module params into kernel operands.

    bf16 by default: MXU operands (weights + in-kernel x cast) go to
    compute_dtype; biases and the value-head row stay f32 (accumulation is f32
    via preferred_element_type).  Pass compute_dtype=jnp.float32 for the exact
    f32 path.
    """
    ni, h0 = params["p_w0"].shape          # num_inputs, 64
    hv0 = params["v_w0"].shape[1]          # 256
    h_last = params["mu_w"].shape[0]       # 64
    no = params["mu_w"].shape[1]           # num_outputs
    hp_pad = _round_up(h0, 128)            # policy tower lane width (64 -> 128)
    pack = _round_up(no + 1, 128)          # mu lanes + 1 value lane, lane-dense
    cdt = jnp.dtype(compute_dtype)
    out_dtype = cdt if cdt == jnp.dtype(jnp.bfloat16) else jnp.dtype(jnp.float32)

    # Fused first layer, columns ordered [value 256 | policy 64 | zeros 64].
    w0 = jnp.zeros((ni, hv0 + hp_pad), jnp.float32)
    w0 = w0.at[:, :hv0].set(params["v_w0"])
    w0 = w0.at[:, hv0:hv0 + h0].set(params["p_w0"])
    b0 = jnp.zeros((1, hv0 + hp_pad), jnp.float32)
    b0 = b0.at[:, :hv0].set(params["v_b0"])
    b0 = b0.at[:, hv0:hv0 + h0].set(params["p_b0"])

    # Policy hidden layer zero-padded to a full (128, 128) slab.
    pw1 = jnp.zeros((hp_pad, hp_pad), jnp.float32).at[:h0, :h0].set(params["p_w1"])
    pb1 = jnp.zeros((1, hp_pad), jnp.float32).at[:, :h0].set(params["p_b1"])

    # mu head zero-padded to (128, pack); padded lanes give tanh(0) = 0.
    mu_w = jnp.zeros((hp_pad, pack), jnp.float32).at[:h_last, :no].set(params["mu_w"])
    mu_b = jnp.zeros((1, pack), jnp.float32).at[:, :no].set(params["mu_b"])

    onehot = jnp.zeros((1, pack), jnp.float32).at[0, no].set(1.0)

    return dict(
        w0=w0.astype(cdt), b0=b0,
        pw1=pw1.astype(cdt), pb1=pb1,
        muw=mu_w.astype(cdt), mub=mu_b,
        vw1=params["v_w1"].astype(cdt), vb1=params["v_b1"],
        vwrow=params["v_w"].T,                    # (1, 256), f32 for the lane reduction
        onehot=onehot,
        vb=params["v_b"],                         # (1, 1) scalar -> SMEM
        meta=dict(num_inputs=ni, num_outputs=no, pack=pack,
                  hidden_v=hv0, hp_pad=hp_pad, w0_cols=hv0 + hp_pad,
                  compute_dtype=cdt, out_dtype=out_dtype),
    )


def actor_critic_forward(inputs, noise, kp, *, tile_b=2048):
    """inputs: (B, num_inputs) f32.  kp: output of prepare_kernel_params."""
    meta = kp["meta"]
    B, ni = inputs.shape
    assert ni == meta["num_inputs"]
    no, pack, hv0 = meta["num_outputs"], meta["pack"], meta["hidden_v"]
    out_dtype = meta["out_dtype"]

    # Batch tiling: multiple of 8 sublanes, bounded VMEM working set.  Prefer
    # >= 2 grid steps (dual-TC on v7x / megacore) when the halves stay >= 256.
    b_ceil = _round_up(max(B, 1), 8)
    tile_b = _round_up(min(int(tile_b), b_ceil), 8)
    half = _round_up((b_ceil + 1) // 2, 8)
    if tile_b >= b_ceil and half >= 256:
        tile_b = half
    b_pad = _round_up(B, tile_b)

    # Only pad the batch when ragged; no feature padding, no dtype repack.
    x = inputs if b_pad == B else jnp.pad(inputs, ((0, b_pad - B), (0, 0)))

    # VMEM budget: resident weights + double-buffered x/out + f32 intermediates.
    w_bytes = sum(int(a.size) * a.dtype.itemsize for k, a in kp.items() if k != "meta")
    row_bytes = (ni * x.dtype.itemsize * 2                       # x tile, double-buffered
                 + pack * jnp.dtype(out_dtype).itemsize * 2      # out tile, double-buffered
                 + (meta["w0_cols"] + hv0 + meta["hp_pad"] + pack) * 4)  # f32 intermediates
    vmem_limit = int(min(40 << 20, max(24 << 20, 2 * (w_bytes + tile_b * row_bytes))))

    kernel = functools.partial(_actor_critic_kernel, hidden_v=hv0)
    rep = lambda i: (0, 0)   # weights: same block every grid step -> VMEM-resident

    packed = pl.pallas_call(
        kernel,
        out_shape=jax.ShapeDtypeStruct((b_pad, pack), out_dtype),
        grid=(b_pad // tile_b,),
        in_specs=[
            pl.BlockSpec((tile_b, ni), lambda i: (i, 0)),        # x tile (full feature dim)
            pl.BlockSpec(kp["w0"].shape, rep),
            pl.BlockSpec(kp["b0"].shape, rep),
            pl.BlockSpec(kp["pw1"].shape, rep),
            pl.BlockSpec(kp["pb1"].shape, rep),
            pl.BlockSpec(kp["muw"].shape, rep),
            pl.BlockSpec(kp["mub"].shape, rep),
            pl.BlockSpec(kp["vw1"].shape, rep),
            pl.BlockSpec(kp["vb1"].shape, rep),
            pl.BlockSpec(kp["vwrow"].shape, rep),
            pl.BlockSpec(kp["onehot"].shape, rep),
            pl.BlockSpec(memory_space=pltpu.MemorySpace.SMEM),   # vb scalar
        ],
        out_specs=pl.BlockSpec((tile_b, pack), lambda i: (i, 0)),
        compiler_params=pltpu.CompilerParams(
            dimension_semantics=("parallel",),
            vmem_limit_bytes=vmem_limit,
        ),
    )(
        x,
        kp["w0"], kp["b0"], kp["pw1"], kp["pb1"], kp["muw"], kp["mub"],
        kp["vw1"], kp["vb1"], kp["vwrow"], kp["onehot"], kp["vb"],
    )

    mu = packed[:B, :no].astype(jnp.float32)
    v = packed[:B, no:no + 1].astype(jnp.float32)
    # log_std is a constant broadcast (noise * ones) -> no kernel work needed.
    log_std = jnp.full((B, no), noise, dtype=jnp.float32)
    return mu, log_std, v


def reference_forward(inputs, noise, p):
    """Pure-JAX reference replicating the PyTorch forward semantics (f32)."""
    h = jax.nn.relu(inputs @ p["p_w0"] + p["p_b0"])
    h = jax.nn.relu(h @ p["p_w1"] + p["p_b1"])
    mu = jnp.tanh(h @ p["mu_w"] + p["mu_b"])
    log_std = noise * jnp.ones_like(mu)
    hv = jax.nn.relu(inputs @ p["v_w0"] + p["v_b0"])
    hv = jax.nn.relu(hv @ p["v_w1"] + p["v_b1"])
    v = hv @ p["v_w"] + p["v_b"]
    return mu, log_std, v


if __name__ == "__main__":
    # Small shapes consistent with the module: 46-dim observation, 12 actions.
    # B=20 with tile_b=8 exercises a multi-step grid plus batch padding (20 -> 24).
    B, NUM_INPUTS, NUM_OUTPUTS = 20, 46, 12

    key = jax.random.PRNGKey(0)
    k_in, k_params = jax.random.split(key)

    inputs = jax.random.normal(k_in, (B, NUM_INPUTS), jnp.float32)
    params = make_params(k_params, NUM_INPUTS, NUM_OUTPUTS)
    noise = 0.0  # self.noise = 0 in the module
    mu_r, log_std_r, v_r = reference_forward(inputs, noise, params)

    # --- default path: bf16 MXU operands + bf16 packed output, f32 accumulation ---
    kparams_bf16 = prepare_kernel_params(params, compute_dtype=jnp.bfloat16)
    mu, log_std, v = actor_critic_forward(inputs, noise, kparams_bf16, tile_b=8)
    jax.block_until_ready((mu, log_std, v))

    assert mu.shape == (B, NUM_OUTPUTS) and log_std.shape == (B, NUM_OUTPUTS) and v.shape == (B, 1)
    assert jnp.allclose(mu, mu_r, atol=2e-2), float(jnp.max(jnp.abs(mu - mu_r)))
    assert jnp.allclose(log_std, log_std_r, atol=1e-6)
    assert jnp.allclose(v, v_r, atol=2e-2), float(jnp.max(jnp.abs(v - v_r)))

    # --- exact f32 path (same kernel, tighter tolerance) ---
    kparams_f32 = prepare_kernel_params(params, compute_dtype=jnp.float32)
    mu32, log_std32, v32 = actor_critic_forward(inputs, noise, kparams_f32, tile_b=8)
    jax.block_until_ready((mu32, log_std32, v32))
    assert jnp.allclose(mu32, mu_r, atol=1e-5), float(jnp.max(jnp.abs(mu32 - mu_r)))
    assert jnp.allclose(v32, v_r, atol=1e-5), float(jnp.max(jnp.abs(v32 - v_r)))

    print("KERNEL_OK")
</pallas_src>

<mosaic_0001>
module attributes {stable_mosaic.version = 11 : i64} {
  func.func @_actor_critic_kernel(%arg0: i32, %arg1: memref<8x46xf32, #tpu.memory_space<vmem>>, %arg2: memref<46x384xbf16, #tpu.memory_space<vmem>>, %arg3: memref<1x384xf32, #tpu.memory_space<vmem>>, %arg4: memref<128x128xbf16, #tpu.memory_space<vmem>>, %arg5: memref<1x128xf32, #tpu.memory_space<vmem>>, %arg6: memref<128x128xbf16, #tpu.memory_space<vmem>>, %arg7: memref<1x128xf32, #tpu.memory_space<vmem>>, %arg8: memref<256x256xbf16, #tpu.memory_space<vmem>>, %arg9: memref<1x256xf32, #tpu.memory_space<vmem>>, %arg10: memref<1x256xf32, #tpu.memory_space<vmem>>, %arg11: memref<1x128xf32, #tpu.memory_space<vmem>>, %arg12: memref<1x1xf32, #tpu.memory_space<smem>>, %arg13: memref<8x128xbf16, #tpu.memory_space<vmem>>) attributes {dimension_semantics = [#tpu.dimension_semantics<parallel>], iteration_bounds = array<i64: 3>, scalar_prefetch = 0 : i64, scratch_operands = 0 : i64, tpu.core_type = #tpu.core_type<tc>, window_params = [{transform_indices = @transform_0, window_bounds = array<i64: 8, 46>}, {pipeline_mode = #tpu.pipeline_mode<synchronous>, transform_indices = @transform_1, window_bounds = array<i64: 46, 384>}, {pipeline_mode = #tpu.pipeline_mode<synchronous>, transform_indices = @transform_2, window_bounds = array<i64: 1, 384>}, {pipeline_mode = #tpu.pipeline_mode<synchronous>, transform_indices = @transform_3, window_bounds = array<i64: 128, 128>}, {pipeline_mode = #tpu.pipeline_mode<synchronous>, transform_indices = @transform_4, window_bounds = array<i64: 1, 128>}, {pipeline_mode = #tpu.pipeline_mode<synchronous>, transform_indices = @transform_5, window_bounds = array<i64: 128, 128>}, {pipeline_mode = #tpu.pipeline_mode<synchronous>, transform_indices = @transform_6, window_bounds = array<i64: 1, 128>}, {pipeline_mode = #tpu.pipeline_mode<synchronous>, transform_indices = @transform_7, window_bounds = array<i64: 256, 256>}, {pipeline_mode = #tpu.pipeline_mode<synchronous>, transform_indices = @transform_8, window_bounds = array<i64: 1, 256>}, {pipeline_mode = #tpu.pipeline_mode<synchronous>, transform_indices = @transform_9, window_bounds = array<i64: 1, 256>}, {pipeline_mode = #tpu.pipeline_mode<synchronous>, transform_indices = @transform_10, window_bounds = array<i64: 1, 128>}, {transform_indices = @transform_11, window_bounds = array<i64: 1, 1>}, {transform_indices = @transform_12, window_bounds = array<i64: 8, 128>}]} {
    %c0 = arith.constant 0 : index
    %c0_0 = arith.constant 0 : index
    %0 = vector.load %arg1[%c0, %c0_0] : memref<8x46xf32, #tpu.memory_space<vmem>>, vector<8x46xf32>
    %1 = arith.truncf %0 : vector<8x46xf32> to vector<8x46xbf16>
    %c0_1 = arith.constant 0 : index
    %c0_2 = arith.constant 0 : index
    %2 = vector.load %arg2[%c0_1, %c0_2] : memref<46x384xbf16, #tpu.memory_space<vmem>>, vector<46x384xbf16>
    %cst = arith.constant dense<0.000000e+00> : vector<8x384xf32>
    %3 = tpu.matmul %1, %2, %cst {dimension_numbers = #tpu.dot_dimension_numbers<[1], [0], [0], [1], [0, 0, 1, 1], [], []>} : vector<8x46xbf16>, vector<46x384xbf16>, vector<8x384xf32> -> vector<8x384xf32>
    %c0_3 = arith.constant 0 : index
    %c0_4 = arith.constant 0 : index
    %4 = vector.load %arg3[%c0_3, %c0_4] : memref<1x384xf32, #tpu.memory_space<vmem>>, vector<1x384xf32>
    %5 = vector.broadcast %4 : vector<1x384xf32> to vector<8x384xf32>
    %6 = arith.addf %3, %5 : vector<8x384xf32>
    %cst_5 = arith.constant 0.000000e+00 : f32
    %7 = vector.broadcast %cst_5 : f32 to vector<8x384xf32>
    %8 = arith.maximumf %6, %7 : vector<8x384xf32>
    %9 = vector.extract_strided_slice %8 {offsets = [0, 0], sizes = [8, 256], strides = [1, 1]} : vector<8x384xf32> to vector<8x256xf32>
    %10 = vector.extract_strided_slice %8 {offsets = [0, 256], sizes = [8, 128], strides = [1, 1]} : vector<8x384xf32> to vector<8x128xf32>
    %11 = arith.truncf %10 : vector<8x128xf32> to vector<8x128xbf16>
    %c0_6 = arith.constant 0 : index
    %c0_7 = arith.constant 0 : index
    %12 = vector.load %arg4[%c0_6, %c0_7] : memref<128x128xbf16, #tpu.memory_space<vmem>>, vector<128x128xbf16>
    %cst_8 = arith.constant dense<0.000000e+00> : vector<8x128xf32>
    %13 = tpu.matmul %11, %12, %cst_8 {dimension_numbers = #tpu.dot_dimension_numbers<[1], [0], [0], [1], [0, 0, 1, 1], [], []>} : vector<8x128xbf16>, vector<128x128xbf16>, vector<8x128xf32> -> vector<8x128xf32>
    %c0_9 = arith.constant 0 : index
    %c0_10 = arith.constant 0 : index
    %14 = vector.load %arg5[%c0_9, %c0_10] : memref<1x128xf32, #tpu.memory_space<vmem>>, vector<1x128xf32>
    %15 = vector.broadcast %14 : vector<1x128xf32> to vector<8x128xf32>
    %16 = arith.addf %13, %15 : vector<8x128xf32>
    %cst_11 = arith.constant 0.000000e+00 : f32
    %17 = vector.broadcast %cst_11 : f32 to vector<8x128xf32>
    %18 = arith.maximumf %16, %17 : vector<8x128xf32>
    %19 = arith.truncf %18 : vector<8x128xf32> to vector<8x128xbf16>
    %c0_12 = arith.constant 0 : index
    %c0_13 = arith.constant 0 : index
    %20 = vector.load %arg6[%c0_12, %c0_13] : memref<128x128xbf16, #tpu.memory_space<vmem>>, vector<128x128xbf16>
    %cst_14 = arith.constant dense<0.000000e+00> : vector<8x128xf32>
    %21 = tpu.matmul %19, %20, %cst_14 {dimension_numbers = #tpu.dot_dimension_numbers<[1], [0], [0], [1], [0, 0, 1, 1], [], []>} : vector<8x128xbf16>, vector<128x128xbf16>, vector<8x128xf32> -> vector<8x128xf32>
    %c0_15 = arith.constant 0 : index
    %c0_16 = arith.constant 0 : index
    %22 = vector.load %arg7[%c0_15, %c0_16] : memref<1x128xf32, #tpu.memory_space<vmem>>, vector<1x128xf32>
    %23 = vector.broadcast %22 : vector<1x128xf32> to vector<8x128xf32>
    %24 = arith.addf %21, %23 : vector<8x128xf32>
    %25 = math.tanh %24 : vector<8x128xf32>
    %26 = arith.truncf %9 : vector<8x256xf32> to vector<8x256xbf16>
    %c0_17 = arith.constant 0 : index
    %c0_18 = arith.constant 0 : index
    %27 = vector.load %arg8[%c0_17, %c0_18] : memref<256x256xbf16, #tpu.memory_space<vmem>>, vector<256x256xbf16>
    %cst_19 = arith.constant dense<0.000000e+00> : vector<8x256xf32>
    %28 = tpu.matmul %26, %27, %cst_19 {dimension_numbers = #tpu.dot_dimension_numbers<[1], [0], [0], [1], [0, 0, 1, 1], [], []>} : vector<8x256xbf16>, vector<256x256xbf16>, vector<8x256xf32> -> vector<8x256xf32>
    %c0_20 = arith.constant 0 : index
    %c0_21 = arith.constant 0 : index
    %29 = vector.load %arg9[%c0_20, %c0_21] : memref<1x256xf32, #tpu.memory_space<vmem>>, vector<1x256xf32>
    %30 = vector.broadcast %29 : vector<1x256xf32> to vector<8x256xf32>
    %31 = arith.addf %28, %30 : vector<8x256xf32>
    %cst_22 = arith.constant 0.000000e+00 : f32
    %32 = vector.broadcast %cst_22 : f32 to vector<8x256xf32>
    %33 = arith.maximumf %31, %32 : vector<8x256xf32>
    %c0_23 = arith.constant 0 : index
    %c0_24 = arith.constant 0 : index
    %34 = vector.load %arg10[%c0_23, %c0_24] : memref<1x256xf32, #tpu.memory_space<vmem>>, vector<1x256xf32>
    %35 = vector.broadcast %34 : vector<1x256xf32> to vector<8x256xf32>
    %36 = arith.mulf %33, %35 : vector<8x256xf32>
    %cst_25 = arith.constant dense<0.000000e+00> : vector<8xf32>
    %37 = vector.multi_reduction <add>, %36, %cst_25 [1] : vector<8x256xf32> to vector<8xf32>
    %38 = vector.shape_cast %37 : vector<8xf32> to vector<8x1xf32>
    %c0_26 = arith.constant 0 : index
    %c0_27 = arith.constant 0 : index
    %39 = memref.load %arg12[%c0_26, %c0_27] : memref<1x1xf32, #tpu.memory_space<smem>>
    %40 = vector.broadcast %39 : f32 to vector<8x1xf32>
    %41 = arith.addf %38, %40 : vector<8x1xf32>
    %c0_28 = arith.constant 0 : index
    %c0_29 = arith.constant 0 : index
    %42 = vector.load %arg11[%c0_28, %c0_29] : memref<1x128xf32, #tpu.memory_space<vmem>>, vector<1x128xf32>
    %43 = vector.broadcast %41 : vector<8x1xf32> to vector<8x128xf32>
    %44 = vector.broadcast %42 : vector<1x128xf32> to vector<8x128xf32>
    %45 = arith.mulf %43, %44 : vector<8x128xf32>
    %46 = arith.addf %25, %45 : vector<8x128xf32>
    %47 = arith.truncf %46 : vector<8x128xf32> to vector<8x128xbf16>
    %c0_30 = arith.constant 0 : index
    %c0_31 = arith.constant 0 : index
    %48 = vector.load %arg13[%c0_30, %c0_31] : memref<8x128xbf16, #tpu.memory_space<vmem>>, vector<8x128xbf16>
    tpu.vector_store %arg13[%c0_30, %c0_31], %47 {strides = array<i32>} : memref<8x128xbf16, #tpu.memory_space<vmem>>, vector<8x128xbf16>,
    return
  }
  func.func @transform_0(%arg0: i32) -> (i32, i32) {
    %c0_i32 = arith.constant 0 : i32
    %c0_i32_0 = arith.constant 0 : i32
    return %arg0, %c0_i32 : i32, i32
  }
  func.func @transform_1(%arg0: i32) -> (i32, i32) {
    %c0_i32 = arith.constant 0 : i32
    %c0_i32_0 = arith.constant 0 : i32
    %c0_i32_1 = arith.constant 0 : i32
    return %c0_i32, %c0_i32_0 : i32, i32
  }
  func.func @transform_2(%arg0: i32) -> (i32, i32) {
    %c0_i32 = arith.constant 0 : i32
    %c0_i32_0 = arith.constant 0 : i32
    %c0_i32_1 = arith.constant 0 : i32
    return %c0_i32, %c0_i32_0 : i32, i32
  }
  func.func @transform_3(%arg0: i32) -> (i32, i32) {
    %c0_i32 = arith.constant 0 : i32
    %c0_i32_0 = arith.constant 0 : i32
    %c0_i32_1 = arith.constant 0 : i32
    return %c0_i32, %c0_i32_0 : i32, i32
  }
  func.func @transform_4(%arg0: i32) -> (i32, i32) {
    %c0_i32 = arith.constant 0 : i32
    %c0_i32_0 = arith.constant 0 : i32
    %c0_i32_1 = arith.constant 0 : i32
    return %c0_i32, %c0_i32_0 : i32, i32
  }
  func.func @transform_5(%arg0: i32) -> (i32, i32) {
    %c0_i32 = arith.constant 0 : i32
    %c0_i32_0 = arith.constant 0 : i32
    %c0_i32_1 = arith.constant 0 : i32
    return %c0_i32, %c0_i32_0 : i32, i32
  }
  func.func @transform_6(%arg0: i32) -> (i32, i32) {
    %c0_i32 = arith.constant 0 : i32
    %c0_i32_0 = arith.constant 0 : i32
    %c0_i32_1 = arith.constant 0 : i32
    return %c0_i32, %c0_i32_0 : i32, i32
  }
  func.func @transform_7(%arg0: i32) -> (i32, i32) {
    %c0_i32 = arith.constant 0 : i32
    %c0_i32_0 = arith.constant 0 : i32
    %c0_i32_1 = arith.constant 0 : i32
    return %c0_i32, %c0_i32_0 : i32, i32
  }
  func.func @transform_8(%arg0: i32) -> (i32, i32) {
    %c0_i32 = arith.constant 0 : i32
    %c0_i32_0 = arith.constant 0 : i32
    %c0_i32_1 = arith.constant 0 : i32
    return %c0_i32, %c0_i32_0 : i32, i32
  }
  func.func @transform_9(%arg0: i32) -> (i32, i32) {
    %c0_i32 = arith.constant 0 : i32
    %c0_i32_0 = arith.constant 0 : i32
    %c0_i32_1 = arith.constant 0 : i32
    return %c0_i32, %c0_i32_0 : i32, i32
  }
  func.func @transform_10(%arg0: i32) -> (i32, i32) {
    %c0_i32 = arith.constant 0 : i32
    %c0_i32_0 = arith.constant 0 : i32
    %c0_i32_1 = arith.constant 0 : i32
    return %c0_i32, %c0_i32_0 : i32, i32
  }
  func.func @transform_11(%arg0: i32) -> (i32, i32) {
    %c0_i32 = arith.constant 0 : i32
    %c0_i32_0 = arith.constant 0 : i32
    %c0_i32_1 = arith.constant 0 : i32
    return %c0_i32, %c0_i32_0 : i32, i32
  }
  func.func @transform_12(%arg0: i32) -> (i32, i32) {
    %c0_i32 = arith.constant 0 : i32
    %c0_i32_0 = arith.constant 0 : i32
    return %arg0, %c0_i32 : i32, i32
  }
}

</mosaic_0001>

<bundles_post_ra>
// kernel: tpu_custom_call.1
= control target key start
LH: loop header
LB: loop body
LE: loop exit
PB: predicated region body
PF: predicated region fallthrough
CT: control target
= control target key end

     0   :  { %s2242_s0 = inlined_call_operand.hbm [shape: f32[24,46], index: 0, kind: input, shape index: {}]   ;;  %s2243_s1 = inlined_call_operand.hbm [shape: bf16[46,384], index: 1, kind: input, shape index: {}]   ;;  %s2244_s2 = inlined_call_operand.vmem [shape: f32[1,384], index: 2, kind: input, shape index: {}]   ;;  %s2245_s3 = inlined_call_operand.hbm [shape: bf16[128,128], index: 3, kind: input, shape index: {}]   ;;  %s2246_s4 = inlined_call_operand.hbm [shape: f32[1,128], index: 4, kind: input, shape index: {}]   ;;  %s2247_s5 = inlined_call_operand.hbm [shape: bf16[128,128], index: 5, kind: input, shape index: {}]   ;;  %s2248_s6 = inlined_call_operand.hbm [shape: f32[1,128], index: 6, kind: input, shape index: {}]   ;;  %s2249_s7 = inlined_call_operand.hbm [shape: bf16[256,256], index: 7, kind: input, shape index: {}]   ;;  %s2250_s8 = inlined_call_operand.vmem [shape: f32[1,256], index: 8, kind: input, shape index: {}]   ;;  %s2251_s9 = inlined_call_operand.vmem [shape: f32[1,256], index: 9, kind: input, shape index: {}]   ;;  %s2252_s10 = inlined_call_operand.vmem [shape: f32[1,128], index: 10, kind: input, shape index: {}]   ;;  %s2253_s11 = inlined_call_operand.<no memory space> [shape: f32[1,1], index: 11, kind: input, shape index: {}]   ;;  %s2254_s12 = inlined_call_operand.hbm [shape: bf16[24,128], index: 12, kind: output, shape index: {}]  }
   0x1   :  { %2256 = sst [smem:[#allocation21_spill]] %s2243_s1 }
   0x2   :  { %2257 = sst [smem:[#allocation22_spill]] %s2245_s3 }
   0x3   :  { %2258 = sst [smem:[#allocation23_spill]] %s2246_s4 }
   0x4   :  { %2259 = sst [smem:[#allocation24_spill]] %s2247_s5 }
   0x5   :  { %2260 = sst [smem:[#allocation25_spill]] %s2248_s6 }
   0x6   :  { %2261 = sst [smem:[#allocation26_spill]] %s2254_s12 }
   0x7   :  { %17 = sst [smem:[#allocation2]] %s2253_s11 }
   0x8   :  { %18 = vsyncpa [#allocation4], 0 }
   0x9   :  { %20 = vsyncpa [#allocation4 + $0x1], 0 }
   0xa   :  { %21 = vsyncpa [#allocation7], 0 }
   0xb   :  { %22 = vsyncpa [#allocation10], 0 }
   0xc   :  { %23 = vsyncpa [#allocation13], 0 }
   0xd   :  { %24 = vsyncpa [#allocation5], 0 }
   0xe   :  { %26 = vsyncpa [#allocation5 + $0x1], 0  ;;  %s2036_s23 = smov 0   ;;  %s2038_s24 = smov 0  }
   0xf   :  { %s2040_s25 = smov 0   ;;  %s2042_s26 = smov 0  }
  0x10 LB: > { %s2262_s1 = sld [smem:[#allocation21_spill]]  ;;  %s2060_s29 = sadd.s32 4294967295, %s1954_s26   ;;  %s1954_s26 = sphi %s2042_s26, %s2278_s26   ;;  %s1950_s25 = sphi %s2040_s25, %s2277_s25   ;;  %s1946_s24 = sphi %s2038_s24, %s2276_s24   ;;  %s1942_s23 = sphi %s2036_s23, %s2275_s23  }
  0x11   : > { %p1237_p0 = scmp.ge.s32.totalorder %s1954_s26, 1  ;;  %p53_p1 = scmp.eq.s32.totalorder %s2060_s29, 0 }
  0x12   : > { %p320_p2 = scmp.lt.s32.totalorder %s1954_s26, 4  ;;  %s1956_s13 = smov [#allocation6]  }
  0x13   : > { %s333_s14 = sshll.u32 %s1956_s13, 4  ;;  %s2264_s4 = sld [smem:[#allocation23_spill]]  ;;  %s334_s14 = int_to_ptr.vmem [resolvable:$true] %s333_s14 }
  0x14   : > { %p2065_p3 = pnand %p1237_p0, %p320_p2  ;;  %s2266_s6 = sld [smem:[#allocation25_spill]] }
  0x15   : > { %s1957_s22 = smov [#allocation9]   ;;  %s1958_s27 = smov 192  }
  0x16   : > { %s331_s28 = sshll.u32 %s2262_s1, 4  ;;  %p1576_p4 = pneg %p2065_p3  ;;  %s332_s28 = int_to_ptr.hbm [resolvable:$true] %s331_s28 }
  0x17   : > { %s365_s11 = sshll.u32 %s1957_s22, 4  ;;  %s1959_s13 = smov 12   ;;  %s366_s11 = int_to_ptr.vmem [resolvable:$true] %s365_s11 }
  0x18   : > { %p2076_p5 = pnand %p1576_p4, %p53_p1  ;;  %s2267_s3 = sld [smem:[#allocation22_spill]] }
  0x19   : > { %s363_s17 = sshll.u32 %s2264_s4, 4  ;;  %s1960_s4 = smov [#allocation12]   ;;  %s364_s17 = int_to_ptr.hbm [resolvable:$true] %s363_s17 }
  0x1a   : > { %s389_s21 = sshll.u32 %s2266_s6, 4  ;;  %s391_s12 = sshll.u32 %s1960_s4, 4  ;;  %s390_s21 = int_to_ptr.hbm [resolvable:$true] %s389_s21  ;;  %s392_s12 = int_to_ptr.vmem [resolvable:$true] %s391_s12 }
  0x1b   : > { %1579 = dma.hbm_to_vmem [thread:$0]  (!%p2076_p5), %s332_s28, 1152, %s334_s14, [#allocation7], %s1958_s27, %s1958_s27, %s1959_s13  }
  0x1c   : > { %1585 = dma.hbm_to_vmem [thread:$0]  (!%p2076_p5), %s364_s17, 16, %s366_s11, [#allocation10]  }
  0x1d   : > { %1591 = dma.hbm_to_vmem [thread:$0]  (!%p2076_p5), %s390_s21, 16, %s392_s12, [#allocation13]  }
  0x1e   : > { %s348_s1 = sshll.u32 %s2267_s3, 4  ;;  %s1961_s19 = smov [#allocation8]   ;;  %s349_s1 = int_to_ptr.hbm [resolvable:$true] %s348_s1 }
  0x1f   : > { %s350_s20 = sshll.u32 %s1961_s19, 4  ;;  %s1962_s22 = smov 64   ;;  %s351_s20 = int_to_ptr.vmem [resolvable:$true] %s350_s20 }
  0x20   : > { %s1963_s28 = smov 4   ;;  %s2268_s5 = sld [smem:[#allocation24_spill]] }
  0x21   : > { %1582 = dma.hbm_to_vmem [thread:$0]  (!%p2076_p5), %s349_s1, 1024, %s351_s20, [#allocation7], %s1962_s22, %s1962_s22, %s1963_s28  }
  0x22   : > { %s1964_s4 = smov [#allocation11]   ;;  %s400_s13 = sshll.u32 %s2249_s7, 4  ;;  %s401_s13 = int_to_ptr.hbm [resolvable:$true] %s400_s13 }
  0x23   : > { %s376_s27 = sshll.u32 %s1964_s4, 4  ;;  %s1965_s1 = smov [#allocation14]   ;;  %s377_s27 = int_to_ptr.vmem [resolvable:$true] %s376_s27 }
  0x24   : > { %s402_s15 = sshll.u32 %s1965_s1, 4  ;;  %s1966_s16 = smov 128   ;;  %s403_s15 = int_to_ptr.vmem [resolvable:$true] %s402_s15 }
  0x25   : > { %s1967_s19 = smov 8   ;;  %s1236_s20 = sadd.s32 4294967294, %s1954_s26  }
  0x26   : > { %s374_s11 = sshll.u32 %s2268_s5, 4  ;;  %s2106_s14 = sadd.s32 1, %s1954_s26   ;;  %s375_s11 = int_to_ptr.hbm [resolvable:$true] %s374_s11 }
  0x27   : > { %1588 = dma.hbm_to_vmem [thread:$0]  (!%p2076_p5), %s375_s11, 1024, %s377_s27, [#allocation10], %s1962_s22, %s1962_s22, %s1963_s28  }
  0x28   : > { %1594 = dma.hbm_to_vmem [thread:$0]  (!%p2076_p5), %s401_s13, 4096, %s403_s15, [#allocation13], %s1966_s16, %s1966_s16, %s1967_s19  }
  0x29   : > { %s36_s17 = ssub.s32 %s1954_s26, %s2106_s14  ;;  %s39_s22 = sadd.s32 1, %s1950_s25 }
  0x2a   : > { %p37_p6 = scmp.eq.s32.totalorder %s36_s17, 0  ;;  %p46_p7 = scmp.ne.s32.totalorder %s1950_s25, %s1946_s24 }
  0x2b   : > { %p47_p8 = scmp.eq.s32.totalorder %s1954_s26, 0  ;;  %p52_p9 = scmp.ne.s32.totalorder %s1946_s24, %s1942_s23 }
  0x2c   : > { %s2117_s28 = scalar_select %p37_p6, %s1950_s25, %s39_s22  }
  0x2d   : > { %p2119_p10 = por %p47_p8, %p46_p7  ;;  %p2125_p11 = por %p53_p1, %p52_p9 }
  0x2e   : > { %p307_p12 = scmp.eq.s32.totalorder %s2060_s29, 2  ;;  %p313_p13 = scmp.eq.s32.totalorder %s1236_s20, 2 }
  0x2f   : > { %p1609_p0 = scmp.lt.s32.totalorder %s1954_s26, 3  ;;  %s428_s4 = sand.u32 1, %s1950_s25  }
  0x30   : > { %p2132_p2 = por %p307_p12, %p46_p7  ;;  %p2136_p4 = por %p313_p13, %p52_p9 }
  0x31   : > { %s1245_s21 = sshll.u32 %s428_s4, 3  ;;  %s1246_s13 = sshll.u32 %s1954_s26, 3 }
  0x32   : > { %s436_s16 = scalar_lea.hbm %s2242_s0, %s1246_s13  ;;  %s432_s19 = scalar_lea.vmem [#allocation3], %s1245_s21 }
  0x33   : > { %s440_s17 = sshll.u32 %s432_s19, 4  ;;  %s438_s22 = sshll.u32 %s436_s16, 4  ;;  %s441_s17 = int_to_ptr.vmem [resolvable:$true] %s440_s17  ;;  %s439_s22 = int_to_ptr.hbm [resolvable:$true] %s438_s22 }
  0x34   : > { %p2146_p5 = pnand %p1609_p0, %p2119_p10  ;;  %s429_s3 = scalar_lea.sflag [#allocation4], %s428_s4 }
  0x35   : > { %s1846_s5 = sshra.s32 %s439_s22, 4  ;;  %s1853_s1 = scalar_lea.hbm %s2242_s0, 24  ;;  %s1847_s5 = int_to_ptr.hbm [resolvable:$true] %s1846_s5 }
  0x36   : > { %s1848_s6 = scalar_lea.hbm %s1847_s5, 8  ;;  %p1850_p7 = pneg %p2146_p5 }
  0x37   : > { %p1849_p6 = scmp.ne.s32.totalorder %s1847_s5, %s1848_s6  ;;  %p1854_p10 = scmp.lt.s32.totalorder %s1847_s5, %s2242_s0 }
  0x38   : > { %p1855_p12 = scmp.lt.s32.totalorder %s1853_s1, %s1848_s6 }
  0x39   : > { %p1851_p8 = pnand %p1850_p7, %p1849_p6 }
  0x3a   : > { %p1856_p13 = por %p1855_p12, %p1854_p10 }
  0x3b   : > { %p1852_p9 = pneg %p1851_p8 }
  0x3d   : > { %p1857_p0 = pnand %p1856_p13, %p1852_p9 }
  0x3f   : > { %1860 = shalt.err (!%p1857_p0)
}
  0x40   : > { %1598 = dma.hbm_to_vmem [thread:$0]  (!%p2146_p5), %s439_s22, 128, %s441_s17, %s429_s3  }
  0x41   : > { %449 = sbr.rel (%p2065_p3) target bundleno = 645 (0x285), region = 68  ;;  %s2163_s4 = sand.u32 (!%p2065_p3), 1, %s1946_s24  }
  0x42   : > { %s1248_s16 = sshll.u32 (!%p2065_p3), %s2163_s4, 3  ;;  %s452_s19 = scalar_lea.sflag (!%p2065_p3), [#allocation4], %s2163_s4 }
  0x43   : > { %s2167_s21 = scalar_lea.vmem (!%p2065_p3), [#allocation3], %s1248_s16 }
  0x46   : > { %1921 = dma.done.wait (%p2125_p11), %s452_s19, 128  }
  0x47   : > { %1923 = vsyncadd (%p2125_p11), %s452_s19, 4294967168 }
  0x48   : > { %1925 = dma.done.wait (%p53_p1), [#allocation7], 2176  }
  0x49   : > { %1927 = vsyncadd (%p53_p1), [#allocation7], 4294965120 }
  0x4a   : > { %1929 = dma.done.wait (%p53_p1), [#allocation10], 1040  }
  0x4b   : > { %1931 = vsyncadd (%p53_p1), [#allocation10], 4294966256 }
  0x4c   : > { %1933 = dma.done.wait (%p53_p1), [#allocation13], 4112  }
  0x4d   : > { %1935 = vsyncadd (%p53_p1), [#allocation13], 4294963184  ;;  %v1290_v0 = vld [vmem:[#allocation6 + $0x38] sm:$0xf]  ;;  %v1499_v1 = vld [vmem:[#allocation6 + $0x40] sm:$0x70] }
  0x4e   : > { %vm599_vm0 = vcmask 1046528   ;;  %v1291_v2 = vor.u32 %v1499_v1, %v1290_v0  ;;  %v1278_v3 = vld [vmem:[#allocation6 + $0x20] sm:$0xf]  ;;  %v1496_v4 = vld [vmem:[#allocation6 + $0x28] sm:$0xf0]  ;;  %v1506_v16 = vld [vmem:[#allocation8 + $0x30] sm:$0xff] }
  0x4f   : > { %v1282_v5 = vld [vmem:[#allocation6 + $0x30] sm:$0xf]  ;;  %v1498_v6 = vld [vmem:[#allocation6 + $0x38] sm:$0x70]  ;;  %v1507_v9 = vld [vmem:[#allocation8 + $0x38] sm:$0xff]  ;;  %v1279_v12 = vor.u32 %v1496_v4, %v1278_v3  ;;  %vm595_vm1 = vcmask 375808  }
  0x50   : > { %v607_v7 = vsel %vm599_vm0, %v1291_v2, 0  ;;  %v1283_v8 = vor.u32 %v1498_v6, %v1282_v5  ;;  %v1270_v10 = vld [vmem:[#allocation6 + $0x18] sm:$0xf]  ;;  %v1495_v11 = vld [vmem:[#allocation6 + $0x20] sm:$0xf0]  ;;  %720 = vmatpush.bf16.msra.mxu3 %v1507_v9  ;;  %v1505_v25 = vld [vmem:[#allocation8 + $0x28] sm:$0xff] }
  0x51   : > { %640 = vmatpush.bf16.msra.mxu2 %v607_v7  ;;  %v1266_v13 = vld [vmem:[#allocation6 + $0x8] sm:$0xf]  ;;  %v1493_v14 = vld [vmem:[#allocation6 + $0x10] sm:$0xf0]  ;;  %v1271_v18 = vor.u32 %v1495_v11, %v1270_v10  ;;  %v1284_v19 = vld [vmem:[#allocation6 + $0x3c] sm:$0x70] }
  0x52   : > { %v601_v15 = vsel %vm599_vm0, %v1283_v8, 0  ;;  %v1497_v17 = vld [vmem:[#allocation6 + $0x34] sm:$0xf]  ;;  %v1258_v20 = vld [vmem:[#allocation6] sm:$0xf]  ;;  %v1267_v22 = vor.u32 %v1493_v14, %v1266_v13  ;;  %v1504_v31 = vld [vmem:[#allocation8 + $0x20] sm:$0xff] }
  0x53   : > { %614 = vmatpush.bf16.msra.mxu1 %v601_v15  ;;  %v1492_v21 = vld [vmem:[#allocation6 + $0x8] sm:$0xf0]  ;;  %v528_v23 = vld [vmem:[%s2167_s21] sm:$0xff]  ;;  %v1287_v24 = vor.u32 %v1497_v17, %v1284_v19  ;;  %v1272_v30 = vld [vmem:[#allocation6 + $0x24] sm:$0xf0]  ;;  %s1082_s22 = sld [smem:[#allocation2]] }
  0x54   : > { %721 = vmatpush.bf16.msra.mxu3 %v1506_v16  ;;  %v1259_v26 = vor.u32 %v1492_v21, %v1258_v20  ;;  %v529_v27 = vpack.c.bf16 %v528_v23, %v528_v23  ;;  %v1494_v29 = vld [vmem:[#allocation6 + $0x1c] sm:$0xf]  ;;  %v1491_v33 = vld [vmem:[#allocation6 + $0x4] sm:$0xf]  ;;  %v1260_v34 = vld [vmem:[#allocation6 + $0xc] sm:$0xf0] }
  0x55   : > { %641 = vmatpush.bf16.msra.mxu2 %v1279_v12  ;;  %v604_v28 = vsel %vm599_vm0, %v1287_v24, 0  ;;  %v1275_v32 = vor.u32 %v1494_v29, %v1272_v30  ;;  %v1503_v35 = vld [vmem:[#allocation8 + $0x18] sm:$0xff]  ;;  %v1263_v36 = vor.u32 %v1491_v33, %v1260_v34  ;;  %v1502_v37 = vld [vmem:[#allocation8 + $0x10] sm:$0xff]  ;;  %v1501_v38 = vld [vmem:[#allocation8 + $0x8] sm:$0xff]  ;;  %s1255_s20 = sshll.u32 %s2163_s4, 2  ;;  %s1488_s13 = sshll.u32 %s2060_s29, 2 }
  0x56   : > { %v1500_v39 = vld [vmem:[#allocation8] sm:$0xff]  ;;  %v1417_v40 = vld [vmem:[#allocation14 + $0x70] sm:$0xf]  ;;  %v1531_v41 = vld [vmem:[#allocation14 + $0x74] sm:$0xf0]  ;;  %s2274_s19 = sld [smem:[#allocation26_spill]] }
  0x57   : > { %615 = vmatpush.bf16.msra.mxu1 %v1271_v18  ;;  %v1530_v42 = vld [vmem:[#allocation14 + $0x74] sm:$0xf]  ;;  %v1418_v43 = vor.u32 %v1531_v41, %v1417_v40  ;;  %v1419_v44 = vld [vmem:[#allocation14 + $0x78] sm:$0xf0]  ;;  %v1409_v46 = vld [vmem:[#allocation14 + $0x60] sm:$0xf] }
  0x58   : > { %722 = vmatpush.bf16.msra.mxu3 %v1505_v25  ;;  %v1515_v45 = vld [vmem:[#allocation11 + $0x38] sm:$0xff]  ;;  %v1422_v47 = vor.u32 %v1530_v42, %v1419_v44  ;;  %v1529_v48 = vld [vmem:[#allocation14 + $0x64] sm:$0xf0]  ;;  %v1481_v49 = vld [vmem:[#allocation14 + $0xf0] sm:$0xf]  ;;  %s526_s3 = scalar_lea.vmem [#allocation15], %s1255_s20 }
  0x59   : > { %642 = vmatpush.bf16.msra.mxu2 %v1267_v22  ;;  %v1547_v50 = vld [vmem:[#allocation14 + $0xf4] sm:$0xf0]  ;;  %803 = vmatpush.bf16.msra.mxu0 %v1515_v45  ;;  %v1410_v51 = vor.u32 %v1529_v48, %v1409_v46  ;;  %v1528_v53 = vld [vmem:[#allocation14 + $0x64] sm:$0xf]  ;;  %v1411_v54 = vld [vmem:[#allocation14 + $0x68] sm:$0xf0] }
  0x5a   : > { %v1482_v52 = vor.u32 %v1547_v50, %v1481_v49  ;;  %v1514_v55 = vld [vmem:[#allocation11 + $0x30] sm:$0xff]  ;;  %v1414_v56 = vor.u32 %v1528_v53, %v1411_v54  ;;  %v1527_v58 = vld [vmem:[#allocation14 + $0x54] sm:$0xf0]  ;;  %v1473_v59 = vld [vmem:[#allocation14 + $0xe0] sm:$0xf]  ;;  %s1106_s5 = sshll.u32 %s526_s3, 4  ;;  %s1107_s5 = int_to_ptr.vmem [resolvable:$true] %s1106_s5 }
  0x5b   : > { %616 = vmatpush.bf16.msra.mxu1 %v1259_v26  ;;  %v1401_v57 = vld [vmem:[#allocation14 + $0x50] sm:$0xf]  ;;  %v1545_v60 = vld [vmem:[#allocation14 + $0xe4] sm:$0xf0]  ;;  %v1526_v61 = vld [vmem:[#allocation14 + $0x54] sm:$0xf] }
  0x5c   : > { %1294 = vmatmul.msk.bf16.vlgmr.msra.gmra.mxu2 %vm595_vm1, %v529_v27  ;;  %723 = vmatpush.bf16.msra.mxu3 %v1504_v31  ;;  %v1403_v62 = vld [vmem:[#allocation14 + $0x58] sm:$0xf0]  ;;  %v1474_v63 = vor.u32 %v1545_v60, %v1473_v59  ;;  %v1402_v0 = vor.u32 %v1527_v58, %v1401_v57  ;;  %v1513_v1 = vld [vmem:[#allocation11 + $0x28] sm:$0xff]  ;;  %v1465_v2 = vld [vmem:[#allocation14 + $0xd0] sm:$0xf]  ;;  %s1104_s21 = scalar_lea.hbm %s2274_s19, %s1488_s13  ;;  %s1094_s29 = scalar_lea.sflag [#allocation5], %s2163_s4 }
  0x5d   : > { %1030 = vmatpush.bf16.msrb.mxu2 %v1482_v52  ;;  %804 = vmatpush.bf16.msra.mxu0 %v1514_v55  ;;  %v1543_v3 = vld [vmem:[#allocation14 + $0xd4] sm:$0xf0]  ;;  %v1406_v4 = vor.u32 %v1526_v61, %v1403_v62  ;;  %v1393_v5 = vld [vmem:[#allocation14 + $0x40] sm:$0xf]  ;;  %v1525_v6 = vld [vmem:[#allocation14 + $0x44] sm:$0xf0] }
  0x5e   : > { %1292 = vmatmul.msk.bf16.vlgmr.msra.gmra.mxu1 %vm595_vm1, %v529_v27  ;;  %v1466_v7 = vor.u32 %v1543_v3, %v1465_v2  ;;  %v1524_v8 = vld [vmem:[#allocation14 + $0x44] sm:$0xf]  ;;  %v1395_v9 = vld [vmem:[#allocation14 + $0x48] sm:$0xf0]  ;;  %v1457_v10 = vld [vmem:[#allocation14 + $0xc0] sm:$0xf]  ;;  %v1394_v12 = vor.u32 %v1525_v6, %v1393_v5 }
  0x5f   : > { %627 = vmatpush.bf16.msrb.mxu1 %v604_v28  ;;  %v1541_v11 = vld [vmem:[#allocation14 + $0xc4] sm:$0xf0]  ;;  %v1512_v13 = vld [vmem:[#allocation11 + $0x20] sm:$0xff]  ;;  %v1398_v14 = vor.u32 %v1524_v8, %v1395_v9  ;;  %v1385_v15 = vld [vmem:[#allocation14 + $0x30] sm:$0xf]  ;;  %s1108_s6 = sshll.u32 %s1104_s21, 4  ;;  %s1109_s6 = int_to_ptr.hbm [resolvable:$true] %s1108_s6 }
  0x60   : > { %724 = vmatpush.bf16.msra.mxu3 %v1503_v35  ;;  %v1523_v16 = vld [vmem:[#allocation14 + $0x34] sm:$0xf0]  ;;  %v1458_v17 = vor.u32 %v1541_v11, %v1457_v10  ;;  %v1522_v18 = vld [vmem:[#allocation14 + $0x34] sm:$0xf]  ;;  %v1387_v19 = vld [vmem:[#allocation14 + $0x38] sm:$0xf0] }
  0x61   : > { %1031 = vmatpush.bf16.msrb.mxu2 %v1474_v63  ;;  %805 = vmatpush.bf16.msra.mxu0 %v1513_v1  ;;  %v1449_v20 = vld [vmem:[#allocation14 + $0xb0] sm:$0xf]  ;;  %v1539_v21 = vld [vmem:[#allocation14 + $0xb4] sm:$0xf0]  ;;  %v1386_v22 = vor.u32 %v1523_v16, %v1385_v15  ;;  %v1390_v24 = vor.u32 %v1522_v18, %v1387_v19  ;;  %v1377_v25 = vld [vmem:[#allocation14 + $0x20] sm:$0xf] }
  0x62   : > { %v1511_v23 = vld [vmem:[#allocation11 + $0x18] sm:$0xff]  ;;  %v1521_v26 = vld [vmem:[#allocation14 + $0x24] sm:$0xf0]  ;;  %v1450_v28 = vor.u32 %v1539_v21, %v1449_v20  ;;  %v1520_v29 = vld [vmem:[#allocation14 + $0x24] sm:$0xf]  ;;  %s1890_s30 = sshra.s32 %s1109_s6, 4  ;;  %s1891_s30 = int_to_ptr.hbm [resolvable:$true] %s1890_s30 }
  0x63   : > { %628 = vmatpush.bf16.msrb.mxu1 %v1275_v32  ;;  %v1379_v30 = vld [vmem:[#allocation14 + $0x28] sm:$0xf0]  ;;  %v1441_v32 = vld [vmem:[#allocation14 + $0xa0] sm:$0xf]  ;;  %v1537_v33 = vld [vmem:[#allocation14 + $0xa4] sm:$0xf0]  ;;  %v1378_v34 = vor.u32 %v1521_v26, %v1377_v25  ;;  %p1897_p5 = scmp.lt.s32.totalorder %s1891_s30, %s2274_s19 }
  0x64   : > { %725 = vmatpush.bf16.msra.mxu3 %v1502_v37  ;;  %v1510_v35 = vld [vmem:[#allocation11 + $0x10] sm:$0xff]  ;;  %v1382_v37 = vor.u32 %v1520_v29, %v1379_v30  ;;  %v1442_v41 = vor.u32 %v1537_v33, %v1441_v32  ;;  %v1535_v46 = vld [vmem:[#allocation14 + $0x94] sm:$0xf0]  ;;  %v1509_v48 = vld [vmem:[#allocation11 + $0x8] sm:$0xff]  ;;  %s1892_s18 = scalar_lea.hbm %s1891_s30, 4  ;;  %s1896_s13 = scalar_lea.hbm %s2274_s19, 12 }
  0x65   : > { %1032 = vmatpush.bf16.msrb.mxu2 %v1466_v7  ;;  %806 = vmatpush.bf16.msra.mxu0 %v1512_v13  ;;  %v1518_v42 = vld [vmem:[#allocation14 + $0x14] sm:$0xf]  ;;  %v1433_v45 = vld [vmem:[#allocation14 + $0x90] sm:$0xf]  ;;  %v1517_v52 = vld [vmem:[#allocation14 + $0x4] sm:$0xf0]  ;;  %p1893_p1 = scmp.ne.s32.totalorder %s1891_s30, %s1892_s18  ;;  %p1898_p6 = scmp.lt.s32.totalorder %s1896_s13, %s1892_s18 }
  0x66   : > { %v1516_v53 = vld [vmem:[#allocation14 + $0x4] sm:$0xf]  ;;  %v1434_v55 = vor.u32 %v1535_v46, %v1433_v45  ;;  %v1546_v57 = vld [vmem:[#allocation14 + $0xf4] sm:$0xf]  ;;  %v1483_v58 = vld [vmem:[#allocation14 + $0xf8] sm:$0xf0] }
  0x67   : > { %629 = vmatpush.bf16.msrb.mxu1 %v1263_v36  ;;  %v1425_v60 = vld [vmem:[#allocation14 + $0x80] sm:$0xf]  ;;  %v1533_v61 = vld [vmem:[#allocation14 + $0x84] sm:$0xf0]  ;;  %v1544_v7 = vld [vmem:[#allocation14 + $0xe4] sm:$0xf]  ;;  %p1894_p3 = pnand %p1893_p1, %p2132_p2  ;;  %p1899_p7 = por %p1898_p6, %p1897_p5 }
  0x68   : > { %726 = vmatpush.bf16.msra.mxu3 %v1501_v38  ;;  %v1369_v38 = vld [vmem:[#allocation14 + $0x10] sm:$0xf]  ;;  %v1508_v2 = vld [vmem:[#allocation11] sm:$0xff]  ;;  %v1426_v5 = vor.u32 %v1533_v61, %v1425_v60  ;;  %v1475_v8 = vld [vmem:[#allocation14 + $0xe8] sm:$0xf0] }
  0x69   : > { %1033 = vmatpush.bf16.msrb.mxu2 %v1458_v17  ;;  %807 = vmatpush.bf16.msra.mxu0 %v1511_v23  ;;  %v1478_v11 = vor.u32 %v1544_v7, %v1475_v8  ;;  %v1542_v17 = vld [vmem:[#allocation14 + $0xd4] sm:$0xf]  ;;  %v1467_v18 = vld [vmem:[#allocation14 + $0xd8] sm:$0xf0]  ;;  %v1540_v20 = vld [vmem:[#allocation14 + $0xc4] sm:$0xf]  ;;  %p1895_p11 = pneg %p1894_p3 }
  0x6a   : > { %v1470_v19 = vor.u32 %v1542_v17, %v1467_v18  ;;  %v1459_v21 = vld [vmem:[#allocation14 + $0xc8] sm:$0xf0]  ;;  %v1538_v23 = vld [vmem:[#allocation14 + $0xb4] sm:$0xf]  ;;  %v1536_v26 = vld [vmem:[#allocation14 + $0xa4] sm:$0xf] }
  0x6b   : > { %1017 = vmatpush.bf16.msra.mxu1 %v1418_v43  ;;  %v1371_v43 = vld [vmem:[#allocation14 + $0x18] sm:$0xf0]  ;;  %v1534_v29 = vld [vmem:[#allocation14 + $0x94] sm:$0xf]  ;;  %v1532_v32 = vld [vmem:[#allocation14 + $0x84] sm:$0xf]  ;;  %p1900_p8 = pnand %p1899_p7, %p1895_p11 }
  0x6c   : > { %727 = vmatpush.bf16.msra.mxu3 %v1500_v39  ;;  %v1519_v39 = vld [vmem:[#allocation14 + $0x14] sm:$0xf0]  ;;  %v1374_v50 = vor.u32 %v1518_v42, %v1371_v43  ;;  %v1435_v30 = vld [vmem:[#allocation14 + $0x98] sm:$0xf0]  ;;  %v1427_v33 = vld [vmem:[#allocation14 + $0x88] sm:$0xf0] }
  0x6d   : > { %1034 = vmatpush.bf16.msrb.mxu2 %v1450_v28  ;;  %808 = vmatpush.bf16.msra.mxu0 %v1510_v35  ;;  %v1661_v35 = vld [vmem:[#allocation9] ss:$0 sm:$0xff] }
  0x6e   : > { %1293 = vmatmul.msk.bf16.vlgmr.msrb.gmra.mxu1 %vm595_vm1, %v529_v27  ;;  %v2195_v27 = vld [vmem:[%s2244_s2] sm:$0x7] }
  0x6f   : > { %1018 = vmatpush.bf16.msra.mxu1 %v1410_v51  ;;  %v544_v31 = vperm.slane %v2195_v27, 0  ;;  %v546_v40 = vperm.slane %v2195_v27, 2  ;;  %v1361_v51 = vld [vmem:[#allocation14] sm:$0xf]  ;;  %v545_v10 = vperm.slane %v2195_v27, 1 }
  0x70   : > { %1043 = vmatpush.bf16.msrb.mxu3 %v1422_v47  ;;  %v1370_v47 = vor.u32 %v1519_v39, %v1369_v38  ;;  %v1362_v63 = vor.u32 %v1517_v52, %v1361_v51  ;;  %v1443_v27 = vld [vmem:[#allocation14 + $0xa8] sm:$0xf0]  ;;  %v851_v39 = vld [vmem:[%s2250_s8] sm:$0x3] }
  0x71   : > { %1035 = vmatpush.bf16.msrb.mxu2 %v1442_v41  ;;  %809 = vmatpush.bf16.msra.mxu0 %v1509_v48  ;;  %v1446_v28 = vor.u32 %v1536_v26, %v1443_v27  ;;  %v853_v42 = vperm.slane %v851_v39, 0 }
  0x73   : > { %1019 = vmatpush.bf16.msra.mxu1 %v1402_v0 }
  0x74   : > { %1044 = vmatpush.bf16.msrb.mxu3 %v1414_v56  ;;  %v1363_v56 = vld [vmem:[#allocation14 + $0x8] sm:$0xf0] }
  0x75   : > { %v1366_v1 = vor.u32 %v1516_v53, %v1363_v56  ;;  %1036 = vmatpush.bf16.msrb.mxu2 %v1434_v55  ;;  %810 = vmatpush.bf16.msra.mxu0 %v1508_v2  ;;  %v854_v53 = vperm.slane %v851_v39, 1  ;;  %v1662_v2 = vld [vmem:[#allocation12] ss:$0 sm:$0xff] }
  0x77   : > { %1020 = vmatpush.bf16.msra.mxu1 %v1394_v12 }
  0x78   : > { %1045 = vmatpush.bf16.msrb.mxu3 %v1406_v4  ;;  %v1486_v4 = vor.u32 %v1546_v57, %v1483_v58 }
  0x79   : > { %1037 = vmatpush.bf16.msrb.mxu2 %v1426_v5  ;;  %v1663_v5 = vld [vmem:[%s2252_s10] ss:$0 sm:$0xff] }
  0x7a   : > { %1056 = vmatpush.bf16.msrb.mxu0 %v1486_v4  ;;  %v1083_v4 = vstv %s1082_s22 }
  0x7b   : > { %1021 = vmatpush.bf16.msra.mxu1 %v1386_v22  ;;  %v1462_v22 = vor.u32 %v1540_v20, %v1459_v21 }
  0x7c   : > { %1046 = vmatpush.bf16.msrb.mxu3 %v1398_v14 }
  0x7e   : > { %1057 = vmatpush.bf16.msrb.mxu0 %v1478_v11 }
  0x7f   : > { %1022 = vmatpush.bf16.msra.mxu1 %v1378_v34  ;;  %v1430_v34 = vor.u32 %v1532_v32, %v1427_v33 }
  0x80   : > { %1047 = vmatpush.bf16.msrb.mxu3 %v1390_v24  ;;  %v1451_v24 = vld [vmem:[#allocation14 + $0xb8] sm:$0xf0] }
  0x81   : > { %v1454_v25 = vor.u32 %v1538_v23, %v1451_v24 }
  0x82   : > { %1058 = vmatpush.bf16.msrb.mxu0 %v1470_v19 }
  0x83   : > { %1023 = vmatpush.bf16.msra.mxu1 %v1370_v47 }
  0x84   : > { %1048 = vmatpush.bf16.msrb.mxu3 %v1382_v37 }
  0x86   : > { %1059 = vmatpush.bf16.msrb.mxu0 %v1462_v22 }
  0x87   : > { %1024 = vmatpush.bf16.msra.mxu1 %v1362_v63 }
  0x88   : > { %1049 = vmatpush.bf16.msrb.mxu3 %v1374_v50 }
  0x8a   : > { %1060 = vmatpush.bf16.msrb.mxu0 %v1454_v25 }
  0x8c   : > { %1050 = vmatpush.bf16.msrb.mxu3 %v1366_v1 }
  0x8e   : > { %1061 = vmatpush.bf16.msrb.mxu0 %v1446_v28 }
  0xdb   : > { %v618_v36 = vpop.f32.mrf.mxu1 }
  0xdc   : > { %v619_v44 = vadd.f32 %v618_v36, %v544_v31  ;;  %v1438_v31 = vor.u32 %v1534_v29, %v1435_v30 }
  0xde   : > { %v648_v59 = vmax.f32 %v619_v44, 0.0  ;;  %1062 = vmatpush.bf16.msrb.mxu0 %v1438_v31 }
  0xdf   : > { %v644_v49 = vpop.f32.mrf.mxu2 }
  0xe0   : > { %v645_v54 = vadd.f32 %v644_v49, %v546_v40  ;;  %v817_v6 = vpack.c.bf16 %v648_v59, %v648_v59 }
  0xe2   : > { %v650_v62 = vmax.f32 %v645_v54, 0.0  ;;  %1025 = vmatmul.bf16.vlgmr.msra.gmra.mxu1 %v817_v6  ;;  %1063 = vmatpush.bf16.msrb.mxu0 %v1430_v34  ;;  %v1071_v54 = vld [vmem:[%s2251_s9] sm:$0x3] }
  0xe3   : > { %v620_v0 = vpop.f32.mrf.mxu1  ;;  %v1073_v59 = vperm.slane %v1071_v54, 0  ;;  %v1074_v60 = vperm.slane %v1071_v54, 1 }
  0xe4   : > { %v651_v3 = vpack.c.bf16 %v650_v62, %v650_v62 }
  0xe6   : > { %728 = vmatmul.bf16.vlgmr.msra.gmra.mxu3 %v651_v3 }
  0xe7   : > { %v646_v9 = vpop.f32.mrf.mxu2 }
  0xeb   : > { %v631_v12 = vpop.f32.mrf.mxu1 }
  0xec   : > { %v632_v13 = vadd.f32 %v631_v12, %v545_v10 }
  0xee   : > { %v649_v14 = vmax.f32 %v632_v13, 0.0 }
  0xf0   : > { %v818_v15 = vpack.c.bf16 %v649_v14, %v649_v14 }
  0xf2   : > { %1038 = vmatmul.bf16.vlgmr.msrb.gmra.mxu2 %v818_v15 }
  0xf3   : > { %v633_v16 = vpop.f32.mrf.mxu1 }
  0xf6   : > { %1051 = vmatmul.bf16.vlgmr.msrb.gmra.mxu3 %v817_v6 }
 0x15f   : > { %v1026_v36 = vpop.f32.mrf.mxu1 }
 0x160   : > { %v1027_v45 = vadd.f32 %v1026_v36, %v853_v42 }
 0x167   : > { %v1028_v43 = vpop.f32.mrf.mxu1 }
 0x169   : > { %v729_v37 = vpop.f32.mrf.mxu3 }
 0x16a   : > { %v730_v38 = vadd.f32 %v1661_v35, %v729_v37 }
 0x16c   : > { %v733_v40 = vmax.f32 %v730_v38, 0.0 }
 0x16e   : > { %v734_v41 = vpack.c.bf16 %v733_v40, %v733_v40 }
 0x170   : > { %811 = vmatmul.bf16.vlgmr.msra.gmra.mxu0 %v734_v41 }
 0x171   : > { %v731_v44 = vpop.f32.mrf.mxu3 }
 0x175   : > { %v1039_v46 = vpop.f32.mrf.mxu2 }
 0x176   : > { %v1040_v47 = vadd.f32 %v1039_v46, %v1027_v45 }
 0x178   : > { %v1069_v57 = vmax.f32 %v1040_v47, 0.0 }
 0x179   : > { %v1052_v48 = vpop.f32.mrf.mxu3 }
 0x17a   : > { %v1053_v55 = vadd.f32 %v1052_v48, %v854_v53  ;;  %v1077_v62 = vmul.f32 %v1073_v59, %v1069_v57 }
 0x17d   : > { %v1041_v49 = vpop.f32.mrf.mxu2 }
 0x180   : > { %1064 = vmatmul.bf16.vlgmr.msrb.gmra.mxu0 %v818_v15 }
 0x181   : > { %v1054_v50 = vpop.f32.mrf.mxu3 }
 0x1ed   : > { %v812_v51 = vpop.f32.mrf.mxu0 }
 0x1ee   : > { %v813_v3 = vadd.f32 %v1662_v2, %v812_v51 }
 0x1f0   : > { %1664 = vtanh.f32 %v813_v3 }
 0x1f5   : > { %v814_v52 = vpop.f32.mrf.mxu0 }
 0x1f6   : > { %v1665_v9 = vpop.eup %1664 }
 0x1fd   : > { %v1065_v56 = vpop.f32.mrf.mxu0 }
 0x1fe   : > { %v1066_v58 = vadd.f32 %v1065_v56, %v1053_v55 }
 0x200   : > { %v1070_v61 = vmax.f32 %v1066_v58, 0.0 }
 0x202   : > { %v1078_v63 = vmul.f32 %v1074_v60, %v1070_v61 }
 0x204   : > { %v1079_v0 = vadd.f32 %v1078_v63, %v1077_v62 }
 0x205   : > { %v1067_v1 = vpop.f32.mrf.mxu0 }
 0x206   : > { %1080 = vadd.xlane.f32.xlu0 %v1079_v0 }
 0x279   : > { %v1081_v6 = vpop.xlane.xlu0 %1080 }
 0x27a   : > { %v1084_v7 = vadd.f32 %v1083_v4, %v1081_v6 }
 0x27c   : > { %v1089_v8 = vmul.f32 %v1663_v5, %v1084_v7 }
 0x27e   : > { %v1090_v10 = vadd.f32 %v1665_v9, %v1089_v8 }
 0x280   : > { %v1091_v11 = vpack.c.bf16 %v1090_v10, %v1090_v10 }
 0x282   : > { %1092 = vst [vmem:[%s526_s3] sm:$0xf] %v1091_v11 }
 0x283   : > { %1903 = shalt.err (!%p1900_p8)
}
 0x284   : > { %1574 = dma.vmem_to_hbm [thread:$0]  (%p2132_p2), %s1107_s5, 64, %s1109_s6, %s1094_s29  }
 0x285 PF: > { %p1616_p9 = scmp.ge.s32.totalorder %s1954_s26, 2  ;;  %s1120_s4 = sand.u32 1, %s1942_s23  }
 0x286   : > { %s1121_s15 = scalar_lea.sflag [#allocation5], %s1120_s4 }
 0x287   : > { %p1600_p10 = pnand %p1616_p9, %p2136_p4 }
 0x289   : > { %p1601_p12 = pneg %p1600_p10 }
 0x28b   : > { %1937 = dma.done.wait (%p1601_p12), %s1121_s15, 64  }
 0x28c   : > { %1939 = vsyncadd (%p1601_p12), %s1121_s15, 4294967232  ;;  %p29_p13 = scmp.ge.s32.totalorder %s2106_s14, 5   ;;  %s2275_s23 = smov %s1946_s24 }
 0x28d   : > { %s2276_s24 = smov %s1950_s25  ;;  %s2277_s25 = smov %s2117_s28 }
 0x28e   : > { %s2278_s26 = smov %s2106_s14  ;;  %31 = sbr.rel (!%p29_p13) target bundleno = 16 (0x10), region = 137 }
 0x293   :  { %1127 = vsyncpa [#allocation4], 1 }
 0x294   :  { %1129 = vsyncpa [#allocation4 + $0x1], 1 }
 0x295   :  { %1130 = vsyncpa [#allocation7], 1 }
 0x296   :  { %1131 = vsyncpa [#allocation10], 1 }
 0x297   :  { %1132 = vsyncpa [#allocation13], 1 }
 0x298   :  { %1133 = vsyncpa [#allocation5], 1 }
 0x299   :  { %1135 = vsyncpa [#allocation5 + $0x1], 1 }

</bundles_post_ra>
